<compile_context>
chip_gen: v7x
topology: tpu7x:2x2x1
jax: 0.10.0
libtpu: 0.0.40
codegen_flags: <defaults>
</compile_context>

<pallas_src>
import jax
import jax.numpy as jnp
from jax.experimental import pallas as pl
from jax.experimental.pallas import tpu as pltpu


def _round_up(x, m):
    return ((x + m - 1) // m) * m


# Cross-generation sizing (v5e 16 MiB default scoped VMEM, v6e 32/128 MiB,
# v7x 32 MiB scoped / 64 MiB physical).
_VMEM_STREAM_BUDGET = 24 << 20   # 2 slabs x 2 pipeline buffers of streamed input
_VMEM_LIMIT_BYTES = 48 << 20     # explicit scoped-VMEM limit (above v5e default,
                                 # below v7x physical)
_FUSED_TABLE_BUDGET = 4 << 20    # per packed table -> fused (in-VMEM) gather path


# ---------------------------------------------------------------------------
# Kernels
# ---------------------------------------------------------------------------

def _glove_fused_kernel(ai_ref, aj_ref, ii_ref, jj_ref, out_ref):
    """Fused path: in-kernel one-hot gather on the MXU + multiply + reduce.

    ai_ref / aj_ref : (Dp, Vp) packed tables, VMEM-resident across the grid
                      (rows = [wi.T ; bi ; 1] and [wj.T ; 1 ; bj], zero padded).
    ii_ref / jj_ref : (1, tb) int32 index blocks (batch on lanes).
    out_ref         : (1, tb) f32 output block (lane-dense -> unmasked stores).
    """
    vp = ai_ref.shape[1]
    tb = ii_ref.shape[1]
    vocab = jax.lax.broadcasted_iota(jnp.int32, (vp, tb), 0)
    oh_i = jnp.where(vocab == ii_ref[...], 1.0, 0.0)            # (Vp, tb) f32
    oh_j = jnp.where(vocab == jj_ref[...], 1.0, 0.0)
    # MXU does the gather: (Dp, Vp) @ (Vp, tb) -> (Dp, tb), batch on lanes.
    gi = jnp.dot(ai_ref[...], oh_i, preferred_element_type=jnp.float32)
    gj = jnp.dot(aj_ref[...], oh_j, preferred_element_type=jnp.float32)
    # sum_d wi*wj + bi*1 + 1*bj   (bias handled by the packed ones rows)
    out_ref[...] = jnp.sum(gi * gj, axis=0, keepdims=True)       # XLU sublane reduce


def _glove_dot_kernel(gi_ref, gj_ref, out_ref):
    """Streaming path: pre-gathered (Dp, tb) slabs -> multiply + sublane reduce."""
    out_ref[...] = jnp.sum(gi_ref[...] * gj_ref[...], axis=0, keepdims=True)


# ---------------------------------------------------------------------------
# Parameter packing (one-time, amortized over all forward calls)
# ---------------------------------------------------------------------------

def prepare_glove_params(params):
    """Packs transposed tables + bias rows + ones row.

        Ai = [wi.T ; bi.T ; 1]   Aj = [wj.T ; 1 ; bj.T]      -> (D+2, V)

    so forward(i, j) = sum over rows of (Ai[:, i] * Aj[:, j]).  Padded to
    (Dp, Vp) with Dp % 8 == 0 (sublane) and Vp % 128 == 0 (lane); padded
    columns/rows are zero and never selected / contribute 0.
    """
    wi, wj, bi, bj = params["wi"], params["wj"], params["bi"], params["bj"]
    V, D = wi.shape
    ones = jnp.ones((1, V), jnp.float32)
    ai = jnp.concatenate([wi.T, bi.T, ones], axis=0)
    aj = jnp.concatenate([wj.T, ones, bj.T], axis=0)
    Dp = _round_up(D + 2, 8)
    Vp = _round_up(V, 128)
    ai = jnp.pad(ai, ((0, Dp - (D + 2)), (0, Vp - V)))
    aj = jnp.pad(aj, ((0, Dp - (D + 2)), (0, Vp - V)))
    return {"ai": ai, "aj": aj, "vocab_size": V, "embedding_dim": D}


# ---------------------------------------------------------------------------
# Forward wrappers
# ---------------------------------------------------------------------------

def _tile_and_grid(B, tb):
    """Clamp tile to the (128-aligned) batch and keep >=2 grid steps (v7x, 2 TCs)."""
    tb = min(tb, _round_up(B, 128))
    grid = -(-B // tb)
    if grid < 2 and B > 128:
        tb = _round_up(-(-B // 2), 128)
        grid = -(-B // tb)
    return tb, grid


def _compiler_params():
    return pltpu.CompilerParams(
        dimension_semantics=("parallel",),
        vmem_limit_bytes=_VMEM_LIMIT_BYTES,
    )


def _forward_fused(ai, aj, i_idx, j_idx, B):
    Dp, Vp = ai.shape
    # Batch tile: lane axis, multiple of 128; cap so the (Vp, tb) one-hot
    # intermediates stay a few MiB of VMEM.
    tb = max(128, min(2048, ((4 << 20) // (Vp * 4)) // 128 * 128))
    tb, grid = _tile_and_grid(B, tb)
    Bp = grid * tb
    pad = Bp - B
    ii = (jnp.pad(i_idx, (0, pad)) if pad else i_idx).reshape(1, Bp)
    jj = (jnp.pad(j_idx, (0, pad)) if pad else j_idx).reshape(1, Bp)

    table_spec = pl.BlockSpec((Dp, Vp), lambda g: (0, 0))   # resident across grid
    idx_spec = pl.BlockSpec((1, tb), lambda g: (0, g))
    out_spec = pl.BlockSpec((1, tb), lambda g: (0, g))

    cost = pl.CostEstimate(
        flops=4 * Dp * Vp * Bp + 2 * Dp * Bp,
        transcendentals=0,
        bytes_accessed=2 * Dp * Vp * 4 + 2 * Bp * 4 + Bp * 4,
    )

    out = pl.pallas_call(
        _glove_fused_kernel,
        out_shape=jax.ShapeDtypeStruct((1, Bp), jnp.float32),
        grid_spec=pltpu.PrefetchScalarGridSpec(
            num_scalar_prefetch=0,
            grid=(grid,),
            in_specs=[table_spec, table_spec, idx_spec, idx_spec],
            out_specs=out_spec,
        ),
        compiler_params=_compiler_params(),
        cost_estimate=cost,
    )(ai, aj, ii, jj)
    return out[0, :B]


def _forward_gathered(ai, aj, i_idx, j_idx, B):
    # Fallback when the packed tables do not fit comfortably in VMEM.
    # TODO(synk): for large D (>= ~128-256 f32 per row) replace the XLA gather
    # with a scalar-prefetched, deeply buffered manual-DMA row gather.
    # TODO(synk): optionally gather from bf16 copies of the tables to halve the
    # streamed HBM bytes (keep the in-kernel reduce in f32).
    Dp, Vp = ai.shape
    bytes_per_col = 2 * Dp * 4                       # both slabs, one batch lane
    # >= ~4 MiB streamed payload per grid step, capped so 2 slabs x 2 pipeline
    # buffers fit the cross-generation VMEM budget.
    tb = min((4 << 20) // bytes_per_col, _VMEM_STREAM_BUDGET // (2 * bytes_per_col))
    tb = max(128, (tb // 128) * 128)
    tb, grid = _tile_and_grid(B, tb)
    Bp = grid * tb
    pad = Bp - B
    # Pad the cheap int32 index vectors BEFORE the gather so the gather emits
    # the padded (Dp, Bp) slabs directly (no extra HBM pad pass).
    ii = jnp.pad(i_idx, (0, pad)) if pad else i_idx
    jj = jnp.pad(j_idx, (0, pad)) if pad else j_idx
    # Tables stored transposed (Dp, Vp): gathering along axis=1 yields the
    # batch-on-lanes layout directly -> no separate transpose pass.
    gi = jnp.take(ai, ii, axis=1)                    # (Dp, Bp)
    gj = jnp.take(aj, jj, axis=1)                    # (Dp, Bp)

    vec_spec = pl.BlockSpec((Dp, tb), lambda g: (0, g))
    out_spec = pl.BlockSpec((1, tb), lambda g: (0, g))
    cost = pl.CostEstimate(
        flops=2 * Dp * Bp,
        transcendentals=0,
        bytes_accessed=2 * Dp * Bp * 4 + Bp * 4,
    )

    out = pl.pallas_call(
        _glove_dot_kernel,
        out_shape=jax.ShapeDtypeStruct((1, Bp), jnp.float32),
        grid_spec=pltpu.PrefetchScalarGridSpec(
            num_scalar_prefetch=0,
            grid=(grid,),
            in_specs=[vec_spec, vec_spec],
            out_specs=out_spec,
        ),
        compiler_params=_compiler_params(),
        cost_estimate=cost,
    )(gi, gj)
    return out[0, :B]


def glove_forward(prepared, i_indices, j_indices):
    """GloVe forward: sum(wi[i] * wj[j], dim=1) + bi[i] + bj[j]."""
    ai, aj = prepared["ai"], prepared["aj"]
    Dp, Vp = ai.shape
    B = i_indices.shape[0]
    i_idx = i_indices.astype(jnp.int32)
    j_idx = j_indices.astype(jnp.int32)
    # Note: like jnp.take, out-of-range indices are clamped (PyTorch would error).
    if Dp * Vp * 4 <= _FUSED_TABLE_BUDGET:
        return _forward_fused(ai, aj, i_idx, j_idx, B)
    return _forward_gathered(ai, aj, i_idx, j_idx, B)


# ---------------------------------------------------------------------------
# Init + demo
# ---------------------------------------------------------------------------

def _xavier_normal(key, shape):
    # torch xavier_normal_ on a 2D weight: std = sqrt(2 / (rows + cols))
    std = (2.0 / (shape[0] + shape[1])) ** 0.5
    return std * jax.random.normal(key, shape, dtype=jnp.float32)


def init_glove_params(key, vocab_size, embedding_dim):
    k_wi, k_wj, k_bi, k_bj = jax.random.split(key, 4)
    return {
        "wi": _xavier_normal(k_wi, (vocab_size, embedding_dim)),
        "wj": _xavier_normal(k_wj, (vocab_size, embedding_dim)),
        "bi": _xavier_normal(k_bi, (vocab_size, 1)),
        "bj": _xavier_normal(k_bj, (vocab_size, 1)),
    }


if __name__ == "__main__":
    vocab_size = 64
    embedding_dim = 32
    batch = 8

    key = jax.random.PRNGKey(0)
    k_params, k_i, k_j = jax.random.split(key, 3)

    params = init_glove_params(k_params, vocab_size, embedding_dim)
    prepared = prepare_glove_params(params)

    i_indices = jax.random.randint(k_i, (batch,), 0, vocab_size, dtype=jnp.int32)
    j_indices = jax.random.randint(k_j, (batch,), 0, vocab_size, dtype=jnp.int32)

    # Pure-JAX reference (matches the PyTorch forward).
    w_i = params["wi"][i_indices]
    w_j = params["wj"][j_indices]
    ref = (jnp.sum(w_i * w_j, axis=1)
           + params["bi"][i_indices, 0]
           + params["bj"][j_indices, 0])

    # Fused (MXU one-hot gather) path -- auto-selected for this small vocab.
    out_fused = jax.block_until_ready(glove_forward(prepared, i_indices, j_indices))
    assert out_fused.shape == (batch,)
    # MXU f32 contraction may run as reduced-precision passes on some
    # generations; the one-hot only multiplies exact 0/1, so any deviation is
    # bounded by sub-f32 rounding of the table values.
    assert jnp.allclose(out_fused, ref, atol=2e-3, rtol=2e-3)

    # Streaming (pre-gathered) fallback path -- exercised explicitly.
    out_gather = jax.block_until_ready(
        _forward_gathered(prepared["ai"], prepared["aj"],
                          i_indices.astype(jnp.int32),
                          j_indices.astype(jnp.int32), batch))
    assert out_gather.shape == (batch,)
    assert jnp.allclose(out_gather, ref, atol=1e-5, rtol=1e-5)

    print("KERNEL_OK")
</pallas_src>

<mosaic_0001>
module attributes {stable_mosaic.version = 11 : i64} {
  func.func @_glove_fused_kernel(%arg0: i32, %arg1: memref<40x128xf32, #tpu.memory_space<vmem>>, %arg2: memref<40x128xf32, #tpu.memory_space<vmem>>, %arg3: memref<1x128xi32, #tpu.memory_space<vmem>>, %arg4: memref<1x128xi32, #tpu.memory_space<vmem>>, %arg5: memref<1x128xf32, #tpu.memory_space<vmem>>) attributes {dimension_semantics = [#tpu.dimension_semantics<parallel>], iteration_bounds = array<i64: 1>, scalar_prefetch = 0 : i64, scratch_operands = 0 : i64, tpu.core_type = #tpu.core_type<tc>, window_params = [{pipeline_mode = #tpu.pipeline_mode<synchronous>, transform_indices = @transform_0, window_bounds = array<i64: 40, 128>}, {pipeline_mode = #tpu.pipeline_mode<synchronous>, transform_indices = @transform_1, window_bounds = array<i64: 40, 128>}, {transform_indices = @transform_2, window_bounds = array<i64: 1, 128>}, {transform_indices = @transform_3, window_bounds = array<i64: 1, 128>}, {transform_indices = @transform_4, window_bounds = array<i64: 1, 128>}]} {
    %0 = tpu.iota {dimensions = array<i32: 0>} : vector<128x128xi32>
    %c0 = arith.constant 0 : index
    %c0_0 = arith.constant 0 : index
    %1 = vector.load %arg3[%c0, %c0_0] : memref<1x128xi32, #tpu.memory_space<vmem>>, vector<1x128xi32>
    %2 = vector.broadcast %1 : vector<1x128xi32> to vector<128x128xi32>
    %3 = arith.cmpi eq, %0, %2 : vector<128x128xi32>
    %cst = arith.constant 1.000000e+00 : f32
    %cst_1 = arith.constant 0.000000e+00 : f32
    %4 = vector.broadcast %cst : f32 to vector<128x128xf32>
    %5 = vector.broadcast %cst_1 : f32 to vector<128x128xf32>
    %6 = arith.select %3, %4, %5 : vector<128x128xi1>, vector<128x128xf32>
    %c0_2 = arith.constant 0 : index
    %c0_3 = arith.constant 0 : index
    %7 = vector.load %arg4[%c0_2, %c0_3] : memref<1x128xi32, #tpu.memory_space<vmem>>, vector<1x128xi32>
    %8 = vector.broadcast %7 : vector<1x128xi32> to vector<128x128xi32>
    %9 = arith.cmpi eq, %0, %8 : vector<128x128xi32>
    %cst_4 = arith.constant 1.000000e+00 : f32
    %cst_5 = arith.constant 0.000000e+00 : f32
    %10 = vector.broadcast %cst_4 : f32 to vector<128x128xf32>
    %11 = vector.broadcast %cst_5 : f32 to vector<128x128xf32>
    %12 = arith.select %9, %10, %11 : vector<128x128xi1>, vector<128x128xf32>
    %c0_6 = arith.constant 0 : index
    %c0_7 = arith.constant 0 : index
    %13 = vector.load %arg1[%c0_6, %c0_7] : memref<40x128xf32, #tpu.memory_space<vmem>>, vector<40x128xf32>
    %cst_8 = arith.constant dense<0.000000e+00> : vector<40x128xf32>
    %14 = tpu.matmul %13, %6, %cst_8 {dimension_numbers = #tpu.dot_dimension_numbers<[1], [0], [0], [1], [0, 0, 1, 1], [], []>} : vector<40x128xf32>, vector<128x128xf32>, vector<40x128xf32> -> vector<40x128xf32>
    %c0_9 = arith.constant 0 : index
    %c0_10 = arith.constant 0 : index
    %15 = vector.load %arg2[%c0_9, %c0_10] : memref<40x128xf32, #tpu.memory_space<vmem>>, vector<40x128xf32>
    %cst_11 = arith.constant dense<0.000000e+00> : vector<40x128xf32>
    %16 = tpu.matmul %15, %12, %cst_11 {dimension_numbers = #tpu.dot_dimension_numbers<[1], [0], [0], [1], [0, 0, 1, 1], [], []>} : vector<40x128xf32>, vector<128x128xf32>, vector<40x128xf32> -> vector<40x128xf32>
    %17 = arith.mulf %14, %16 : vector<40x128xf32>
    %cst_12 = arith.constant dense<0.000000e+00> : vector<128xf32>
    %18 = vector.multi_reduction <add>, %17, %cst_12 [0] : vector<40x128xf32> to vector<128xf32>
    %19 = vector.shape_cast %18 : vector<128xf32> to vector<1x128xf32>
    %c0_13 = arith.constant 0 : index
    %c0_14 = arith.constant 0 : index
    %20 = vector.load %arg5[%c0_13, %c0_14] : memref<1x128xf32, #tpu.memory_space<vmem>>, vector<1x128xf32>
    tpu.vector_store %arg5[%c0_13, %c0_14], %19 {strides = array<i32>} : memref<1x128xf32, #tpu.memory_space<vmem>>, vector<1x128xf32>,
    return
  }
  func.func @transform_0(%arg0: i32) -> (i32, i32) {
    %c0_i32 = arith.constant 0 : i32
    %c0_i32_0 = arith.constant 0 : i32
    %c0_i32_1 = arith.constant 0 : i32
    return %c0_i32, %c0_i32_0 : i32, i32
  }
  func.func @transform_1(%arg0: i32) -> (i32, i32) {
    %c0_i32 = arith.constant 0 : i32
    %c0_i32_0 = arith.constant 0 : i32
    %c0_i32_1 = arith.constant 0 : i32
    return %c0_i32, %c0_i32_0 : i32, i32
  }
  func.func @transform_2(%arg0: i32) -> (i32, i32) {
    %c0_i32 = arith.constant 0 : i32
    %c0_i32_0 = arith.constant 0 : i32
    return %c0_i32, %arg0 : i32, i32
  }
  func.func @transform_3(%arg0: i32) -> (i32, i32) {
    %c0_i32 = arith.constant 0 : i32
    %c0_i32_0 = arith.constant 0 : i32
    return %c0_i32, %arg0 : i32, i32
  }
  func.func @transform_4(%arg0: i32) -> (i32, i32) {
    %c0_i32 = arith.constant 0 : i32
    %c0_i32_0 = arith.constant 0 : i32
    return %c0_i32, %arg0 : i32, i32
  }
}

</mosaic_0001>

<bundles_post_ra>
// kernel: tpu_custom_call.1
= control target key start
LH: loop header
LB: loop body
LE: loop exit
PB: predicated region body
PF: predicated region fallthrough
CT: control target
= control target key end

     0   :  { %9 = vsyncpa [#allocation3], 0  ;;  %s841_s0 = inlined_call_operand.hbm [shape: f32[40,128], index: 0, kind: input, shape index: {}]   ;;  %s842_s1 = inlined_call_operand.hbm [shape: f32[40,128], index: 1, kind: input, shape index: {}]   ;;  %s843_s2 = inlined_call_operand.vmem [shape: s32[1,128], index: 2, kind: input, shape index: {}]   ;;  %s844_s3 = inlined_call_operand.vmem [shape: s32[1,128], index: 3, kind: input, shape index: {}]   ;;  %s845_s4 = inlined_call_operand.hbm [shape: f32[1,128], index: 4, kind: output, shape index: {}]  }
   0x1   :  { %10 = vsyncpa [#allocation6], 0 }
   0x2   :  { %11 = vsyncpa [#allocation4], 0  ;;  %s658_s15 = smov [#allocation2]   ;;  %s586_s19 = scalar_lea.hbm %s841_s0, 640 }
   0x3   :  { %s17_s16 = sshll.u32 %s658_s15, 4  ;;  %p587_p0 = scmp.ne.s32.totalorder %s841_s0, %s586_s19  ;;  %s18_s16 = int_to_ptr.vmem [resolvable:$true] %s17_s16 }
   0x4   :  { %p590_p1 = scmp.lt.u32.totalorder %s586_s19, %s841_s0 }
   0x6   :  { %p592_p2 = pnand %p590_p1, %p587_p0 }
   0x8   :  { %595 = shalt.err (!%p592_p2)
}
   0x9   :  { %s596_s24 = scalar_lea.vmem %s18_s16, 640  ;;  %p601_p4 = scmp.lt.s32.totalorder %s18_s16, %s18_s16 }
   0xa   :  { %p597_p3 = scmp.ne.s32.totalorder %s18_s16, %s596_s24  ;;  %p602_p5 = scmp.lt.s32.totalorder %s596_s24, %s596_s24 }
   0xc   :  { %p603_p6 = por %p602_p5, %p601_p4 }
   0xe   :  { %p604_p7 = pnand %p603_p6, %p597_p3 }
  0x10   :  { %607 = shalt.err (!%p604_p7)
}
  0x11   :  { %s659_s25 = smov 128   ;;  %s660_s26 = smov 8  }
  0x12   :  { %23 = dma.hbm_to_vmem [thread:$0]  %s841_s0, 640, %s18_s16, [#allocation3], %s659_s25, %s659_s25, %s660_s26  }
  0x13   :  { %s661_s29 = smov [#allocation5]   ;;  %s608_s7 = scalar_lea.hbm %s842_s1, 640 }
  0x14   :  { %s29_s30 = sshll.u32 %s661_s29, 4  ;;  %p609_p8 = scmp.ne.s32.totalorder %s842_s1, %s608_s7  ;;  %s30_s30 = int_to_ptr.vmem [resolvable:$true] %s29_s30 }
  0x15   :  { %p612_p9 = scmp.lt.u32.totalorder %s608_s7, %s842_s1 }
  0x17   :  { %p614_p10 = pnand %p612_p9, %p609_p8 }
  0x19   :  { %617 = shalt.err (!%p614_p10)
}
  0x1a   :  { %s618_s12 = scalar_lea.vmem %s30_s30, 640  ;;  %p623_p12 = scmp.lt.s32.totalorder %s30_s30, %s30_s30 }
  0x1b   :  { %p619_p11 = scmp.ne.s32.totalorder %s30_s30, %s618_s12  ;;  %p624_p13 = scmp.lt.s32.totalorder %s618_s12, %s618_s12 }
  0x1d   :  { %p625_p0 = por %p624_p13, %p623_p12 }
  0x1f   :  { %p626_p1 = pnand %p625_p0, %p619_p11 }
  0x21   :  { %629 = shalt.err (!%p626_p1)
}
  0x22   :  { %35 = dma.hbm_to_vmem [thread:$0]  %s842_s1, 640, %s30_s30, [#allocation6], %s659_s25, %s659_s25, %s660_s26  }
  0x23   :  { %652 = dma.done.wait [#allocation3], 640  }
  0x24   :  { %653 = vsyncadd [#allocation3], 4294966656 }
  0x25   :  { %654 = dma.done.wait [#allocation6], 640  }
  0x26   :  { %655 = vsyncadd [#allocation6], 4294966656  ;;  %v46_v0 = vlaneseq  ;;  %v662_v1 = vmov 0.0|0.0   ;;  %vm663_vm0 = vmmov 0   ;;  %v664_v3 = vmov 0.0   ;;  %v137_v22 = vld [vmem:[#allocation2] sm:$0xff] }
  0x27   :  { %529 = vmatprep.subr.bf16.mxu0 %v662_v1  ;;  %553 = vmatprep.subr.bf16.mxu1 %v662_v1  ;;  %v730_v7 = vld [vmem:[%s843_s2] ss:$0 sm:$0xff]  ;;  %v665_v11 = vmov 1.0|1.0   ;;  %v232_v23 = vld [vmem:[#allocation5] sm:$0xff]  ;;  %v233_v25 = vld [vmem:[#allocation5 + $0x8] sm:$0xff] }
  0x28   :  { %v718_v2 = vshrl.u32 %v46_v0, 7  ;;  %467 = vmatprep.mubr.msk.f32.mxu0 %vm663_vm0, %v664_v3  ;;  %514 = vmatprep.mubr.msk.f32.mxu1 %vm663_vm0, %v664_v3  ;;  %v735_v8 = vld [vmem:[%s844_s3] ss:$0 sm:$0xff]  ;;  %v138_v24 = vld [vmem:[#allocation2 + $0x8] sm:$0xff]  ;;  %v139_v26 = vld [vmem:[#allocation2 + $0x10] sm:$0xff]  ;;  %s666_s2 = smov [#allocation7]  }
  0x29   :  { %v234_v27 = vld [vmem:[#allocation5 + $0x10] sm:$0xff]  ;;  %v235_v29 = vld [vmem:[#allocation5 + $0x18] sm:$0xff]  ;;  %v236_v31 = vld [vmem:[#allocation5 + $0x20] sm:$0xff]  ;;  %s349_s3 = sshll.u32 %s666_s2, 4  ;;  %s350_s3 = int_to_ptr.vmem [resolvable:$true] %s349_s3 }
  0x2a   :  { %v48_v4 = vadd.s32 8, %v718_v2  ;;  %v49_v5 = vadd.s32 16, %v718_v2  ;;  %v50_v6 = vadd.s32 24, %v718_v2  ;;  %v51_v9 = vadd.s32 32, %v718_v2  ;;  %v140_v28 = vld [vmem:[#allocation2 + $0x18] sm:$0xff]  ;;  %v141_v30 = vld [vmem:[#allocation2 + $0x20] sm:$0xff]  ;;  %p635_p3 = scmp.lt.s32.totalorder %s350_s3, %s350_s3 }
  0x2b   :  { %v52_v10 = vadd.s32 40, %v718_v2  ;;  %vm68_vm1 = vcmp.eq.s32.totalorder %v718_v2, %v730_v7  ;;  %vm105_vm3 = vcmp.eq.s32.totalorder %v718_v2, %v735_v8  ;;  %v53_v12 = vadd.s32 48, %v718_v2  ;;  %s630_s17 = scalar_lea.vmem %s350_s3, 16  ;;  %s634_s18 = scalar_lea.vmem %s350_s3, 32 }
  0x2c   :  { %vm69_vm2 = vcmp.eq.s32.totalorder %v48_v4, %v730_v7  ;;  %vm106_vm4 = vcmp.eq.s32.totalorder %v48_v4, %v735_v8  ;;  %vm70_vm6 = vcmp.eq.s32.totalorder %v49_v5, %v730_v7  ;;  %vm71_vm7 = vcmp.eq.s32.totalorder %v50_v6, %v730_v7  ;;  %p631_p2 = scmp.ne.s32.totalorder %s350_s3, %s630_s17  ;;  %p636_p4 = scmp.lt.s32.totalorder %s634_s18, %s630_s17 }
  0x2d   :  { %vm530_vm5 = vmpackc.low %vm69_vm2, %vm68_vm1  ;;  %vm107_vm8 = vcmp.eq.s32.totalorder %v49_v5, %v735_v8  ;;  %vm108_vm9 = vcmp.eq.s32.totalorder %v50_v6, %v735_v8  ;;  %vm72_vm13 = vcmp.eq.s32.totalorder %v51_v9, %v730_v7  ;;  %vm73_vm14 = vcmp.eq.s32.totalorder %v52_v10, %v730_v7 }
  0x2e   :  { %531 = vmatpush3.bf16.msk.msra.mxu0 %vm530_vm5, %v665_v11  ;;  %vm554_vm10 = vmpackc.low %vm106_vm4, %vm105_vm3  ;;  %v54_v13 = vadd.s32 56, %v718_v2  ;;  %vm109_vm15 = vcmp.eq.s32.totalorder %v51_v9, %v735_v8  ;;  %vm110_vm1 = vcmp.eq.s32.totalorder %v52_v10, %v735_v8  ;;  %vm74_vm4 = vcmp.eq.s32.totalorder %v53_v12, %v730_v7  ;;  %p637_p5 = por %p636_p4, %p635_p3 }
  0x2f   :  { %555 = vmatpush3.bf16.msk.msra.mxu1 %vm554_vm10, %v665_v11  ;;  %532 = vmatprep.subr.bf16.mxu0 %v662_v1  ;;  %vm533_vm11 = vmpackc.low %vm71_vm7, %vm70_vm6  ;;  %v55_v14 = vadd.s32 64, %v718_v2  ;;  %v56_v15 = vadd.s32 72, %v718_v2  ;;  %vm111_vm6 = vcmp.eq.s32.totalorder %v53_v12, %v735_v8  ;;  %v57_v16 = vadd.s32 80, %v718_v2 }
  0x30   :  { %556 = vmatprep.subr.bf16.mxu1 %v662_v1  ;;  %vm557_vm12 = vmpackc.low %vm108_vm9, %vm107_vm8  ;;  %vm75_vm5 = vcmp.eq.s32.totalorder %v54_v13, %v730_v7  ;;  %vm112_vm7 = vcmp.eq.s32.totalorder %v54_v13, %v735_v8  ;;  %v58_v17 = vadd.s32 88, %v718_v2  ;;  %v59_v18 = vadd.s32 96, %v718_v2  ;;  %p638_p6 = pnand %p637_p5, %p631_p2 }
  0x31   :  { %vm536_vm2 = vmpackc.low %vm73_vm14, %vm72_vm13  ;;  %vm76_vm10 = vcmp.eq.s32.totalorder %v55_v14, %v730_v7  ;;  %vm114_vm13 = vcmp.eq.s32.totalorder %v56_v15, %v735_v8  ;;  %v60_v19 = vadd.s32 104, %v718_v2  ;;  %v61_v20 = vadd.s32 112, %v718_v2 }
  0x32   :  { %534 = vmatpush3.bf16.msk.msra.mxu0 %vm533_vm11, %v665_v11  ;;  %vm560_vm3 = vmpackc.low %vm110_vm1, %vm109_vm15  ;;  %vm77_vm11 = vcmp.eq.s32.totalorder %v56_v15, %v730_v7  ;;  %vm78_vm1 = vcmp.eq.s32.totalorder %v57_v16, %v730_v7  ;;  %v62_v21 = vadd.s32 120, %v718_v2 }
  0x33   :  { %558 = vmatpush3.bf16.msk.msra.mxu1 %vm557_vm12, %v665_v11  ;;  %535 = vmatprep.subr.bf16.mxu0 %v662_v1  ;;  %vm539_vm8 = vmpackc.low %vm75_vm5, %vm74_vm4  ;;  %vm113_vm12 = vcmp.eq.s32.totalorder %v55_v14, %v735_v8  ;;  %vm116_vm4 = vcmp.eq.s32.totalorder %v58_v17, %v735_v8 }
  0x34   :  { %559 = vmatprep.subr.bf16.mxu1 %v662_v1  ;;  %vm563_vm9 = vmpackc.low %vm112_vm7, %vm111_vm6  ;;  %vm80_vm7 = vcmp.eq.s32.totalorder %v59_v18, %v730_v7 }
  0x35   :  { %vm542_vm14 = vmpackc.low %vm77_vm11, %vm76_vm10  ;;  %vm118_vm10 = vcmp.eq.s32.totalorder %v60_v19, %v735_v8 }
  0x36   :  { %537 = vmatpush3.bf16.msk.msra.mxu0 %vm536_vm2, %v665_v11  ;;  %vm566_vm15 = vmpackc.low %vm114_vm13, %vm113_vm12  ;;  %vm79_vm2 = vcmp.eq.s32.totalorder %v58_v17, %v730_v7  ;;  %vm82_vm13 = vcmp.eq.s32.totalorder %v61_v20, %v730_v7 }
  0x37   :  { %561 = vmatpush3.bf16.msk.msra.mxu1 %vm560_vm3, %v665_v11  ;;  %538 = vmatprep.subr.bf16.mxu0 %v662_v1  ;;  %vm115_vm3 = vcmp.eq.s32.totalorder %v57_v16, %v735_v8  ;;  %vm545_vm5 = vmpackc.low %vm79_vm2, %vm78_vm1  ;;  %vm120_vm1 = vcmp.eq.s32.totalorder %v62_v21, %v735_v8 }
  0x38   :  { %562 = vmatprep.subr.bf16.mxu1 %v662_v1  ;;  %vm569_vm6 = vmpackc.low %vm116_vm4, %vm115_vm3 }
  0x3a   :  { %540 = vmatpush3.bf16.msk.msra.mxu0 %vm539_vm8, %v665_v11  ;;  %vm81_vm8 = vcmp.eq.s32.totalorder %v60_v19, %v730_v7 }
  0x3b   :  { %564 = vmatpush3.bf16.msk.msra.mxu1 %vm563_vm9, %v665_v11  ;;  %541 = vmatprep.subr.bf16.mxu0 %v662_v1  ;;  %vm117_vm9 = vcmp.eq.s32.totalorder %v59_v18, %v735_v8  ;;  %vm548_vm11 = vmpackc.low %vm81_vm8, %vm80_vm7 }
  0x3c   :  { %565 = vmatprep.subr.bf16.mxu1 %v662_v1  ;;  %vm572_vm12 = vmpackc.low %vm118_vm10, %vm117_vm9 }
  0x3e   :  { %543 = vmatpush3.bf16.msk.msra.mxu0 %vm542_vm14, %v665_v11  ;;  %vm83_vm14 = vcmp.eq.s32.totalorder %v62_v21, %v730_v7 }
  0x3f   :  { %567 = vmatpush3.bf16.msk.msra.mxu1 %vm566_vm15, %v665_v11  ;;  %544 = vmatprep.subr.bf16.mxu0 %v662_v1  ;;  %vm119_vm15 = vcmp.eq.s32.totalorder %v61_v20, %v735_v8  ;;  %vm551_vm2 = vmpackc.low %vm83_vm14, %vm82_vm13 }
  0x40   :  { %568 = vmatprep.subr.bf16.mxu1 %v662_v1  ;;  %vm575_vm3 = vmpackc.low %vm120_vm1, %vm119_vm15 }
  0x42   :  { %546 = vmatpush3.bf16.msk.msra.mxu0 %vm545_vm5, %v665_v11 }
  0x43   :  { %570 = vmatpush3.bf16.msk.msra.mxu1 %vm569_vm6, %v665_v11  ;;  %547 = vmatprep.subr.bf16.mxu0 %v662_v1 }
  0x44   :  { %571 = vmatprep.subr.bf16.mxu1 %v662_v1 }
  0x46   :  { %549 = vmatpush3.bf16.msk.msra.mxu0 %vm548_vm11, %v665_v11 }
  0x47   :  { %573 = vmatpush3.bf16.msk.msra.mxu1 %vm572_vm12, %v665_v11  ;;  %550 = vmatprep.subr.bf16.mxu0 %v662_v1 }
  0x48   :  { %574 = vmatprep.subr.bf16.mxu1 %v662_v1 }
  0x4a   :  { %552 = vmatpush3.bf16.msk.msra.mxu0 %vm551_vm2, %v665_v11 }
  0x4b   :  { %576 = vmatpush3.bf16.msk.msra.mxu1 %vm575_vm3, %v665_v11 }
  0x4d   :  { %468 = vmatmul.mubr.f32.vlgmr.msra.gmra.mrb[0].mxu0 %v137_v22 }
  0x4e   :  { %515 = vmatmul.mubr.f32.vlgmr.msra.gmra.mrb[0].mxu1 %v232_v23  ;;  %470 = vmatprep.mubr.msk.f32.mxu0 %vm663_vm0, %v664_v3 }
  0x4f   :  { %517 = vmatprep.mubr.msk.f32.mxu1 %vm663_vm0, %v664_v3 }
  0x51   :  { %471 = vmatmul.mubr.f32.gmra.mrb[2].mxu0 %v138_v24 }
  0x52   :  { %518 = vmatmul.mubr.f32.gmra.mrb[2].mxu1 %v233_v25  ;;  %473 = vmatprep.mubr.msk.f32.mxu0 %vm663_vm0, %v664_v3 }
  0x53   :  { %520 = vmatprep.mubr.msk.f32.mxu1 %vm663_vm0, %v664_v3 }
  0x55   :  { %474 = vmatmul.mubr.f32.gmra.mrb[4].mxu0 %v139_v26 }
  0x56   :  { %521 = vmatmul.mubr.f32.gmra.mrb[4].mxu1 %v234_v27  ;;  %476 = vmatprep.mubr.msk.f32.mxu0 %vm663_vm0, %v664_v3 }
  0x57   :  { %523 = vmatprep.mubr.msk.f32.mxu1 %vm663_vm0, %v664_v3 }
  0x59   :  { %477 = vmatmul.mubr.f32.gmra.mrb[6].mxu0 %v140_v28 }
  0x5a   :  { %524 = vmatmul.mubr.f32.gmra.mrb[6].mxu1 %v235_v29  ;;  %479 = vmatprep.mubr.msk.f32.mxu0 %vm663_vm0, %v664_v3 }
  0x5b   :  { %526 = vmatprep.mubr.msk.f32.mxu1 %vm663_vm0, %v664_v3 }
  0x5d   :  { %480 = vmatmul.mubr.f32.gmra.mrb[8].mxu0 %v141_v30 }
  0x5e   :  { %527 = vmatmul.mubr.f32.gmra.mrb[8].mxu1 %v236_v31 }
 0x120   :  { %v208_v32 = vpop.f32.mrb[0].mxu0 }
 0x121   :  { %v303_v33 = vpop.f32.mrb[0].mxu1  ;;  %v469_v34 = vpop.f32.mrb[1].mxu0 }
 0x122   :  { %v327_v35 = vmul.f32 %v303_v33, %v208_v32  ;;  %v516_v36 = vpop.f32.mrb[1].mxu1 }
 0x124   :  { %v213_v37 = vpop.f32.mrb[2].mxu0 }
 0x125   :  { %v308_v38 = vpop.f32.mrb[2].mxu1  ;;  %v472_v39 = vpop.f32.mrb[3].mxu0 }
 0x126   :  { %v328_v40 = vmul.f32 %v308_v38, %v213_v37  ;;  %v519_v41 = vpop.f32.mrb[3].mxu1 }
 0x128   :  { %v332_v42 = vadd.f32 %v328_v40, %v327_v35  ;;  %v218_v43 = vpop.f32.mrb[4].mxu0 }
 0x129   :  { %v313_v44 = vpop.f32.mrb[4].mxu1  ;;  %v475_v45 = vpop.f32.mrb[5].mxu0 }
 0x12a   :  { %v329_v46 = vmul.f32 %v313_v44, %v218_v43  ;;  %v522_v47 = vpop.f32.mrb[5].mxu1 }
 0x12c   :  { %v333_v48 = vadd.f32 %v332_v42, %v329_v46  ;;  %v223_v49 = vpop.f32.mrb[6].mxu0 }
 0x12d   :  { %v318_v50 = vpop.f32.mrb[6].mxu1  ;;  %v478_v51 = vpop.f32.mrb[7].mxu0 }
 0x12e   :  { %v330_v52 = vmul.f32 %v318_v50, %v223_v49  ;;  %v525_v53 = vpop.f32.mrb[7].mxu1 }
 0x130   :  { %v334_v54 = vadd.f32 %v333_v48, %v330_v52  ;;  %v228_v55 = vpop.f32.mrb[8].mxu0 }
 0x131   :  { %v323_v56 = vpop.f32.mrb[8].mxu1  ;;  %v481_v57 = vpop.f32.mrb[9].mxu0 }
 0x132   :  { %v331_v58 = vmul.f32 %v323_v56, %v228_v55  ;;  %v528_v59 = vpop.f32.mrb[9].mxu1 }
 0x134   :  { %v335_v60 = vadd.f32 %v334_v54, %v331_v58 }
 0x136   :  { %v336_v61 = vrot.slane %v335_v60, 4 }
 0x138   :  { %v337_v62 = vadd.f32 %v336_v61, %v335_v60 }
 0x13a   :  { %v338_v63 = vrot.slane %v337_v62, 2 }
 0x13c   :  { %v339_v0 = vadd.f32 %v338_v63, %v337_v62 }
 0x13e   :  { %v340_v1 = vrot.slane %v339_v0, 1 }
 0x140   :  { %v341_v2 = vadd.f32 %v340_v1, %v339_v0 }
 0x142   :  { %342 = vst [vmem:[#allocation7] sm:$0x1] %v341_v2 }
 0x143   :  { %641 = shalt.err (!%p638_p6)
}
 0x144   :  { %s642_s21 = scalar_lea.hbm %s845_s4, 16 }
 0x145   :  { %p643_p7 = scmp.ne.s32.totalorder %s845_s4, %s642_s21  ;;  %p646_p8 = scmp.lt.u32.totalorder %s642_s21, %s845_s4 }
 0x147   :  { %p648_p9 = pnand %p646_p8, %p643_p7 }
 0x149   :  { %651 = shalt.err (!%p648_p9)
}
 0x14a   :  { %352 = dma.vmem_to_hbm [thread:$0]  %s350_s3, 16, %s845_s4, [#allocation4]  }
 0x14b   :  { %656 = dma.done.wait [#allocation4], 16  }
 0x14c   :  { %657 = vsyncadd [#allocation4], 4294967280 }
 0x14d   :  { %356 = vsyncpa [#allocation3], 1 }
 0x14e   :  { %357 = vsyncpa [#allocation6], 1 }
 0x14f   :  { %358 = vsyncpa [#allocation4], 1 }

</bundles_post_ra>
